<compile_context>
chip_gen: v7x
topology: tpu7x:2x2x1
jax: 0.10.0
libtpu: 0.0.40
codegen_flags: <defaults>
</compile_context>

<pallas_src>
import math

import jax
import jax.numpy as jnp
from jax.experimental import pallas as pl
from jax.experimental.pallas import tpu as pltpu


def _round_up(x, m):
    return ((x + m - 1) // m) * m


def _vmem_budgets(override_budget, override_limit):
    """Generation-aware (tiling budget, scoped vmem limit) in bytes."""
    cap = None
    try:
        cap = getattr(pltpu.get_tpu_info(), "vmem_capacity_bytes", None)
    except Exception:
        cap = None
    if cap is not None and cap >= 96 * 1024 * 1024:
        # v5e / v6e: 128 MiB VMEM per TensorCore -> big row tiles survive.
        budget, limit = 88 * 1024 * 1024, 100 * 1024 * 1024
    else:
        # v7x (64 MiB) or unknown: leave headroom for Mosaic internal scratch.
        budget, limit = 36 * 1024 * 1024, 50 * 1024 * 1024
    if override_budget is not None:
        budget = override_budget
    if override_limit is not None:
        limit = override_limit
    return budget, limit


def _choose_tiles(M, in_dim, bottle_dim, x_itemsize, w_itemsize, out_itemsize,
                  vmem_budget_bytes, fuse_residual=False):
    """Pick (tm, tn) so the pipelined working set fits the VMEM budget."""
    # Column tile: lane-dense output blocks; only split very wide in_dim and
    # never go below 512 (small out tiles hurt store/DMA efficiency).
    tn = in_dim
    if in_dim > 4096 and in_dim % 128 == 0:
        for cand in (4096, 2048, 1024, 512):
            if in_dim % cand == 0:
                tn = cand
                break
    b_bufs = 1 if tn == in_dim else 2  # lora_B single-buffered when resident

    tm_cap = max(8, _round_up(M, 8))
    tm = 8
    for cand in (1024, 512, 256, 128, 64, 32, 16, 8):
        if cand > tm_cap:
            continue
        vmem = (2 * cand * in_dim * x_itemsize            # x row tile, double-buffered
                + 2 * cand * tn * out_itemsize            # out tile, double-buffered
                + 1 * in_dim * bottle_dim * w_itemsize    # lora_A, single-buffered
                + b_bufs * bottle_dim * tn * w_itemsize   # lora_B
                + cand * bottle_dim * w_itemsize)         # h scratch (lora_B dtype)
        if fuse_residual:
            vmem += 2 * cand * tn * out_itemsize          # residual tile
        if vmem <= vmem_budget_bytes:
            tm = cand
            break
    if tm > M:
        tm = M  # single full-extent row block (always layout-legal)
    return tm, tn


def _make_kernel(scaling, cache_h, fuse_residual):
    def kernel(x_ref, a_ref, b_ref, *rest):
        if fuse_residual:
            y_ref, rest = rest[0], rest[1:]
        o_ref = rest[0]
        h_ref = rest[1] if cache_h else None

        if cache_h:
            # h = scaling * (x @ A): computed once per row tile (column step 0),
            # scaled at (tm, r), cast ONCE to the second-matmul dtype, cached.
            @pl.when(pl.program_id(1) == 0)
            def _():
                h_new = jnp.dot(x_ref[...], a_ref[...],
                                preferred_element_type=jnp.float32)
                h_ref[...] = (h_new * scaling).astype(h_ref.dtype)

            h = h_ref[...]
        else:
            # Recompute variant (single row tile, several column tiles): both
            # grid axes stay "parallel" so v7x's two TCs split the j axis.
            h = jnp.dot(x_ref[...], a_ref[...],
                        preferred_element_type=jnp.float32) * scaling
            h = h.astype(b_ref.dtype)

        acc = jnp.dot(h, b_ref[...], preferred_element_type=jnp.float32)
        if fuse_residual:
            acc = acc + y_ref[...].astype(jnp.float32)
        o_ref[...] = acc.astype(o_ref.dtype)

    return kernel


def lora_forward(x, lora_A, lora_B, *, residual=None, tm=None, tn=None,
                 vmem_budget_bytes=None, vmem_limit_bytes=None):
    """LoRA forward: (1/bottle_dim) * ((x @ lora_A) @ lora_B) [+ residual].

    x: (..., in_dim); lora_A: (in_dim, bottle_dim); lora_B: (bottle_dim, in_dim).
    If `residual` (same shape/dtype as x) is given, returns residual + lora(x)
    with the residual buffer aliased to the output.
    Note: with bf16 weights, h is cast to bf16 before the second dot (f32
    accumulation is kept); this is a deliberate, tolerable precision trade.
    """
    *lead, in_dim = x.shape
    in_dim_a, bottle_dim = lora_A.shape
    assert in_dim_a == in_dim and lora_B.shape == (bottle_dim, in_dim)
    scaling = 1.0 / bottle_dim
    out_dtype = x.dtype

    M = 1
    for d in lead:
        M *= d
    x2d = x.reshape(M, in_dim)

    fuse_residual = residual is not None
    if fuse_residual:
        assert residual.shape == x.shape and residual.dtype == out_dtype
        res2d = residual.reshape(M, in_dim)

    budget, limit = _vmem_budgets(vmem_budget_bytes, vmem_limit_bytes)
    auto_tm, auto_tn = _choose_tiles(
        M, in_dim, bottle_dim,
        x_itemsize=x.dtype.itemsize,
        w_itemsize=lora_A.dtype.itemsize,
        out_itemsize=x.dtype.itemsize,
        vmem_budget_bytes=budget,
        fuse_residual=fuse_residual)

    tm = auto_tm if tm is None else min(tm, M)
    tn = auto_tn if tn is None else tn
    # Validate (possibly user-supplied) tiles against layout rules.
    assert tm == M or tm % 8 == 0, "tm must be a multiple of 8 or equal the row count"
    assert in_dim % tn == 0 and (tn == in_dim or tn % 128 == 0), \
        "tn must divide in_dim and be a multiple of 128 (or the full in_dim)"

    grid_m = pl.cdiv(M, tm)          # ragged M handled by masked partial block
    grid_n = in_dim // tn
    grid = (grid_m, grid_n)

    # Single row tile + several column tiles -> recompute h per column step so
    # both axes can be "parallel" (v7x megacore). Otherwise cache h in scratch.
    cache_h = not (grid_m == 1 and grid_n > 1)

    # Resident weights: constant index maps, single-buffered.
    a_spec = pl.BlockSpec((in_dim, bottle_dim), lambda i, j: (0, 0),
                          pipeline_mode=pl.Buffered(1))
    if grid_n == 1:
        b_spec = pl.BlockSpec((bottle_dim, tn), lambda i, j: (0, 0),
                              pipeline_mode=pl.Buffered(1))
    else:
        b_spec = pl.BlockSpec((bottle_dim, tn), lambda i, j: (0, j))

    in_specs = [
        pl.BlockSpec((tm, in_dim), lambda i, j: (i, 0)),  # fetched once per i
        a_spec,
        b_spec,
    ]
    operands = [x2d, lora_A, lora_B]
    io_aliases = {}
    if fuse_residual:
        in_specs.append(pl.BlockSpec((tm, tn), lambda i, j: (i, j)))
        operands.append(res2d)
        io_aliases = {3: 0}  # residual buffer aliased to the output

    scratch = [pltpu.VMEM((tm, bottle_dim), lora_B.dtype)] if cache_h else []
    dims = ("parallel", "arbitrary") if cache_h else ("parallel", "parallel")

    out2d = pl.pallas_call(
        _make_kernel(scaling, cache_h, fuse_residual),
        out_shape=jax.ShapeDtypeStruct((M, in_dim), out_dtype),
        grid_spec=pltpu.PrefetchScalarGridSpec(
            num_scalar_prefetch=0,
            grid=grid,
            in_specs=in_specs,
            out_specs=pl.BlockSpec((tm, tn), lambda i, j: (i, j)),
            scratch_shapes=scratch,
        ),
        compiler_params=pltpu.CompilerParams(
            dimension_semantics=dims,
            vmem_limit_bytes=limit,
        ),
        input_output_aliases=io_aliases,
    )(*operands)

    return out2d.reshape(x.shape)


def init_lora_params(key, in_dim, bottle_dim, dtype=jnp.float32):
    """Matches nn.init.kaiming_uniform_(lora_A, a=sqrt(5)); lora_B zeros."""
    # For a (in_dim, bottle_dim) tensor: fan_in = bottle_dim,
    # gain = sqrt(2/(1+5)), bound = gain*sqrt(3/fan_in) = 1/sqrt(bottle_dim).
    bound = 1.0 / math.sqrt(bottle_dim)
    lora_A = jax.random.uniform(
        key, (in_dim, bottle_dim), dtype=jnp.float32,
        minval=-bound, maxval=bound).astype(dtype)
    lora_B = jnp.zeros((bottle_dim, in_dim), dtype=dtype)
    return lora_A, lora_B


def _reference(x, lora_A, lora_B):
    scaling = 1.0 / lora_A.shape[1]
    xf = x.astype(jnp.float32)
    h = jnp.dot(xf, lora_A.astype(jnp.float32),
                precision=jax.lax.Precision.HIGHEST)
    y = jnp.dot(h, lora_B.astype(jnp.float32),
                precision=jax.lax.Precision.HIGHEST)
    return scaling * y


if __name__ == "__main__":
    key = jax.random.PRNGKey(0)
    k_x, k_a, k_b, k_y = jax.random.split(key, 4)

    batch, seq, in_dim, bottle_dim = 2, 8, 256, 16

    # --- f32, zero-init lora_B (exact module init) ---------------------------
    x = jax.random.normal(k_x, (batch, seq, in_dim), dtype=jnp.float32)
    lora_A, lora_B = init_lora_params(k_a, in_dim, bottle_dim, dtype=jnp.float32)
    out = jax.block_until_ready(lora_forward(x, lora_A, lora_B))
    assert out.shape == x.shape and out.dtype == x.dtype
    assert jnp.allclose(out, jnp.zeros_like(out), atol=1e-6)

    # --- f32, non-zero lora_B (full forward math) -----------------------------
    lora_B_rnd = 0.1 * jax.random.normal(k_b, (bottle_dim, in_dim), dtype=jnp.float32)
    ref = _reference(x, lora_A, lora_B_rnd)
    out = jax.block_until_ready(lora_forward(x, lora_A, lora_B_rnd))
    assert jnp.allclose(out, ref, atol=2e-3, rtol=2e-2), \
        float(jnp.max(jnp.abs(out - ref)))

    # --- bf16 I/O (f32 accumulation inside the kernel) ------------------------
    x16 = x.astype(jnp.bfloat16)
    a16 = lora_A.astype(jnp.bfloat16)
    b16 = lora_B_rnd.astype(jnp.bfloat16)
    ref16 = _reference(x16, a16, b16)
    out16 = jax.block_until_ready(lora_forward(x16, a16, b16))
    assert out16.shape == x16.shape and out16.dtype == jnp.bfloat16
    assert jnp.allclose(out16.astype(jnp.float32), ref16, atol=2e-2, rtol=1e-1)

    # --- ragged M (no pad/slice copies) + multi-column cached-h path ----------
    x_rag = jax.random.normal(k_x, (2, 7, in_dim), dtype=jnp.float32)  # M = 14
    ref_rag = _reference(x_rag, lora_A, lora_B_rnd)
    out_rag = jax.block_until_ready(
        lora_forward(x_rag, lora_A, lora_B_rnd, tm=8, tn=128))   # grid (2, 2)
    assert out_rag.shape == x_rag.shape
    assert jnp.allclose(out_rag, ref_rag, atol=2e-3, rtol=2e-2)

    # --- single row tile + column tiles -> recompute-h (both axes parallel) ---
    out_rc = jax.block_until_ready(
        lora_forward(x_rag, lora_A, lora_B_rnd, tn=128))         # grid (1, 2)
    assert jnp.allclose(out_rc, ref_rag, atol=2e-3, rtol=2e-2)

    # --- fused residual (aliased output) --------------------------------------
    y_res = jax.random.normal(k_y, x.shape, dtype=jnp.float32)
    expected = y_res + _reference(x, lora_A, lora_B_rnd)
    out_res = jax.block_until_ready(
        lora_forward(x, lora_A, lora_B_rnd, residual=y_res))
    assert jnp.allclose(out_res, expected, atol=2e-3, rtol=2e-2)

    print("KERNEL_OK")
</pallas_src>

<mosaic_0001>
module attributes {stable_mosaic.version = 11 : i64} {
  func.func @kernel(%arg0: i32, %arg1: i32, %arg2: memref<16x256xf32, #tpu.memory_space<vmem>>, %arg3: memref<256x16xf32, #tpu.memory_space<vmem>>, %arg4: memref<16x256xf32, #tpu.memory_space<vmem>>, %arg5: memref<16x256xf32, #tpu.memory_space<vmem>>, %arg6: memref<16x16xf32, #tpu.memory_space<vmem>>) attributes {dimension_semantics = [#tpu.dimension_semantics<parallel>, #tpu.dimension_semantics<arbitrary>], iteration_bounds = array<i64: 1, 1>, scalar_prefetch = 0 : i64, scratch_operands = 1 : i64, tpu.core_type = #tpu.core_type<tc>, window_params = [{transform_indices = @transform_0, window_bounds = array<i64: 16, 256>}, {pipeline_mode = #tpu.pipeline_mode<synchronous>, transform_indices = @transform_1, window_bounds = array<i64: 256, 16>}, {pipeline_mode = #tpu.pipeline_mode<synchronous>, transform_indices = @transform_2, window_bounds = array<i64: 16, 256>}, {transform_indices = @transform_3, window_bounds = array<i64: 16, 256>}]} {
    %c0_i32 = arith.constant 0 : i32
    %0 = arith.cmpi eq, %arg1, %c0_i32 : i32
    %1 = arith.extui %0 : i1 to i32
    %c0_i32_0 = arith.constant 0 : i32
    %2 = arith.cmpi ne, %1, %c0_i32_0 : i32
    scf.if %2 {
      %c0_6 = arith.constant 0 : index
      %c0_7 = arith.constant 0 : index
      %7 = vector.load %arg2[%c0_6, %c0_7] : memref<16x256xf32, #tpu.memory_space<vmem>>, vector<16x256xf32>
      %c0_8 = arith.constant 0 : index
      %c0_9 = arith.constant 0 : index
      %8 = vector.load %arg3[%c0_8, %c0_9] : memref<256x16xf32, #tpu.memory_space<vmem>>, vector<256x16xf32>
      %cst_10 = arith.constant dense<0.000000e+00> : vector<16x16xf32>
      %9 = tpu.matmul %7, %8, %cst_10 {dimension_numbers = #tpu.dot_dimension_numbers<[1], [0], [0], [1], [0, 0, 1, 1], [], []>} : vector<16x256xf32>, vector<256x16xf32>, vector<16x16xf32> -> vector<16x16xf32>
      %cst_11 = arith.constant 6.250000e-02 : f32
      %10 = vector.broadcast %cst_11 : f32 to vector<16x16xf32>
      %11 = arith.mulf %9, %10 : vector<16x16xf32>
      %c0_12 = arith.constant 0 : index
      %c0_13 = arith.constant 0 : index
      %12 = vector.load %arg6[%c0_12, %c0_13] : memref<16x16xf32, #tpu.memory_space<vmem>>, vector<16x16xf32>
      tpu.vector_store %arg6[%c0_12, %c0_13], %11 {strides = array<i32>} : memref<16x16xf32, #tpu.memory_space<vmem>>, vector<16x16xf32>,
    } else {
    }
    %c0 = arith.constant 0 : index
    %c0_1 = arith.constant 0 : index
    %3 = vector.load %arg6[%c0, %c0_1] : memref<16x16xf32, #tpu.memory_space<vmem>>, vector<16x16xf32>
    %c0_2 = arith.constant 0 : index
    %c0_3 = arith.constant 0 : index
    %4 = vector.load %arg4[%c0_2, %c0_3] : memref<16x256xf32, #tpu.memory_space<vmem>>, vector<16x256xf32>
    %cst = arith.constant dense<0.000000e+00> : vector<16x256xf32>
    %5 = tpu.matmul %3, %4, %cst {dimension_numbers = #tpu.dot_dimension_numbers<[1], [0], [0], [1], [0, 0, 1, 1], [], []>} : vector<16x16xf32>, vector<16x256xf32>, vector<16x256xf32> -> vector<16x256xf32>
    %c0_4 = arith.constant 0 : index
    %c0_5 = arith.constant 0 : index
    %6 = vector.load %arg5[%c0_4, %c0_5] : memref<16x256xf32, #tpu.memory_space<vmem>>, vector<16x256xf32>
    tpu.vector_store %arg5[%c0_4, %c0_5], %5 {strides = array<i32>} : memref<16x256xf32, #tpu.memory_space<vmem>>, vector<16x256xf32>,
    return
  }
  func.func @transform_0(%arg0: i32, %arg1: i32) -> (i32, i32) {
    %c0_i32 = arith.constant 0 : i32
    %c0_i32_0 = arith.constant 0 : i32
    return %arg0, %c0_i32 : i32, i32
  }
  func.func @transform_1(%arg0: i32, %arg1: i32) -> (i32, i32) {
    %c0_i32 = arith.constant 0 : i32
    %c0_i32_0 = arith.constant 0 : i32
    %c0_i32_1 = arith.constant 0 : i32
    return %c0_i32, %c0_i32_0 : i32, i32
  }
  func.func @transform_2(%arg0: i32, %arg1: i32) -> (i32, i32) {
    %c0_i32 = arith.constant 0 : i32
    %c0_i32_0 = arith.constant 0 : i32
    %c0_i32_1 = arith.constant 0 : i32
    return %c0_i32, %c0_i32_0 : i32, i32
  }
  func.func @transform_3(%arg0: i32, %arg1: i32) -> (i32, i32) {
    %c0_i32 = arith.constant 0 : i32
    return %arg0, %arg1 : i32, i32
  }
}

</mosaic_0001>

<bundles_post_ra>
// kernel: tpu_custom_call.1
= control target key start
LH: loop header
LB: loop body
LE: loop exit
PB: predicated region body
PF: predicated region fallthrough
CT: control target
= control target key end

     0   :  { %s505_s0 = inlined_call_operand.vmem [shape: f32[16,256], index: 0, kind: input, shape index: {}]   ;;  %s506_s1 = inlined_call_operand.vmem [shape: f32[256,16], index: 1, kind: input, shape index: {}]   ;;  %s507_s2 = inlined_call_operand.vmem [shape: f32[16,256], index: 2, kind: input, shape index: {}]   ;;  %s508_s3 = inlined_call_operand.hbm [shape: f32[16,256], index: 3, kind: output, shape index: {}]  }
   0x1   :  { %v39_v0 = vld [vmem:[%s506_s1 + $0x80] sm:$0xff]  ;;  %v40_v1 = vld [vmem:[%s506_s1 + $0x88] sm:$0xff]  ;;  %v41_v5 = vld [vmem:[%s506_s1 + $0x90] sm:$0xff] }
   0x2   :  { %v23_v2 = vld [vmem:[%s506_s1] sm:$0xff]  ;;  %v285_v3 = vpack.c.bf16 %v40_v1, %v39_v0  ;;  %v24_v4 = vld [vmem:[%s506_s1 + $0x8] sm:$0xff]  ;;  %v42_v6 = vld [vmem:[%s506_s1 + $0x98] sm:$0xff] }
   0x3   :  { %v287_v7 = vpack.c.bf16 %v24_v4, %v23_v2  ;;  %v289_v8 = vpack.c.bf16 %v42_v6, %v41_v5  ;;  %v25_v9 = vld [vmem:[%s506_s1 + $0x10] sm:$0xff]  ;;  %v26_v10 = vld [vmem:[%s506_s1 + $0x18] sm:$0xff]  ;;  %v43_v11 = vld [vmem:[%s506_s1 + $0xa0] sm:$0xff] }
   0x4   :  { %286 = vmatprep.subr.bf16.mxu0 %v285_v3  ;;  %v44_v12 = vld [vmem:[%s506_s1 + $0xa8] sm:$0xff]  ;;  %v291_v13 = vpack.c.bf16 %v26_v10, %v25_v9  ;;  %v27_v15 = vld [vmem:[%s506_s1 + $0x20] sm:$0xff]  ;;  %v45_v17 = vld [vmem:[%s506_s1 + $0xb0] sm:$0xff] }
   0x5   :  { %288 = vmatpush3.bf16.msra.mxu0 %v287_v7  ;;  %v293_v14 = vpack.c.bf16 %v44_v12, %v43_v11  ;;  %v28_v16 = vld [vmem:[%s506_s1 + $0x28] sm:$0xff]  ;;  %v46_v18 = vld [vmem:[%s506_s1 + $0xb8] sm:$0xff]  ;;  %v29_v21 = vld [vmem:[%s506_s1 + $0x30] sm:$0xff] }
   0x6   :  { %290 = vmatprep.subr.bf16.mxu0 %v289_v8  ;;  %v295_v19 = vpack.c.bf16 %v28_v16, %v27_v15  ;;  %v297_v20 = vpack.c.bf16 %v46_v18, %v45_v17  ;;  %v30_v22 = vld [vmem:[%s506_s1 + $0x38] sm:$0xff]  ;;  %v47_v23 = vld [vmem:[%s506_s1 + $0xc0] sm:$0xff]  ;;  %v48_v24 = vld [vmem:[%s506_s1 + $0xc8] sm:$0xff] }
   0x7   :  { %v20_v25 = vld [vmem:[%s505_s0 + $0x8] sm:$0xff]  ;;  %v299_v26 = vpack.c.bf16 %v30_v22, %v29_v21 }
   0x8   :  { %119 = vmatprep.mubr.f32.mxu0 %v20_v25 }
   0x9   :  { %292 = vmatpush3.bf16.msra.mxu0 %v291_v13 }
   0xa   :  { %294 = vmatprep.subr.bf16.mxu0 %v293_v14 }
   0xd   :  { %296 = vmatpush3.bf16.msra.mxu0 %v295_v19 }
   0xe   :  { %8 = vsyncpa [#allocation4], 0  ;;  %298 = vmatprep.subr.bf16.mxu0 %v297_v20  ;;  %v301_v27 = vpack.c.bf16 %v48_v24, %v47_v23  ;;  %v31_v28 = vld [vmem:[%s506_s1 + $0x40] sm:$0xff]  ;;  %v32_v29 = vld [vmem:[%s506_s1 + $0x48] sm:$0xff]  ;;  %v349_v58 = vmov 0.0   ;;  %vm132_vm0 = vcmask 130048  }
   0xf   :  { %v49_v30 = vld [vmem:[%s506_s1 + $0xd0] sm:$0xff]  ;;  %v50_v31 = vld [vmem:[%s506_s1 + $0xd8] sm:$0xff]  ;;  %v303_v32 = vpack.c.bf16 %v32_v29, %v31_v28  ;;  %v51_v36 = vld [vmem:[%s506_s1 + $0xe0] sm:$0xff]  ;;  %212 = vmatprep.mubr.f32.mxu1 %v349_v58 }
  0x10   :  { %v305_v33 = vpack.c.bf16 %v50_v31, %v49_v30  ;;  %v33_v34 = vld [vmem:[%s506_s1 + $0x50] sm:$0xff]  ;;  %v34_v35 = vld [vmem:[%s506_s1 + $0x58] sm:$0xff]  ;;  %v52_v37 = vld [vmem:[%s506_s1 + $0xe8] sm:$0xff] }
  0x11   :  { %300 = vmatpush3.bf16.msra.mxu0 %v299_v26  ;;  %v307_v38 = vpack.c.bf16 %v34_v35, %v33_v34  ;;  %v309_v39 = vpack.c.bf16 %v52_v37, %v51_v36  ;;  %v35_v40 = vld [vmem:[%s506_s1 + $0x60] sm:$0xff]  ;;  %v36_v41 = vld [vmem:[%s506_s1 + $0x68] sm:$0xff]  ;;  %v53_v42 = vld [vmem:[%s506_s1 + $0xf0] sm:$0xff] }
  0x12   :  { %302 = vmatprep.subr.bf16.mxu0 %v301_v27  ;;  %v54_v43 = vld [vmem:[%s506_s1 + $0xf8] sm:$0xff]  ;;  %v311_v44 = vpack.c.bf16 %v36_v41, %v35_v40  ;;  %v37_v46 = vld [vmem:[%s506_s1 + $0x70] sm:$0xff]  ;;  %v19_v49 = vld [vmem:[%s505_s0] sm:$0xff] }
  0x13   :  { %v313_v45 = vpack.c.bf16 %v54_v43, %v53_v42  ;;  %v38_v47 = vld [vmem:[%s506_s1 + $0x78] sm:$0xff]  ;;  %v21_v51 = vld [vmem:[%s505_s0 + $0x10] sm:$0xff]  ;;  %v138_v52 = vld [vmem:[%s507_s2 + $0x8] sm:$0xff] }
  0x14   :  { %v315_v48 = vpack.c.bf16 %v38_v47, %v37_v46  ;;  %v22_v50 = vld [vmem:[%s505_s0 + $0x18] sm:$0xff]  ;;  %v137_v55 = vld [vmem:[%s507_s2] sm:$0xff]  ;;  %v139_v56 = vld [vmem:[%s507_s2 + $0x10] sm:$0xff]  ;;  %s350_s0 = smov [#allocation3]  }
  0x15   :  { %304 = vmatpush3.bf16.msra.mxu0 %v303_v32  ;;  %v140_v53 = vld [vmem:[%s507_s2 + $0x18] sm:$0xff]  ;;  %v319_v57 = vpack.c.bf16 %v139_v56, %v137_v55  ;;  %s234_s2 = sshll.u32 %s350_s0, 4  ;;  %s235_s2 = int_to_ptr.vmem [resolvable:$true] %s234_s2 }
  0x16   :  { %306 = vmatprep.subr.bf16.mxu0 %v305_v33  ;;  %v317_v54 = vpack.c.bf16 %v140_v53, %v138_v52  ;;  %s325_s10 = scalar_lea.vmem %s235_s2, 512  ;;  %p330_p1 = scmp.lt.s32.totalorder %s235_s2, %s235_s2 }
  0x17   :  { %p326_p0 = scmp.ne.s32.totalorder %s235_s2, %s325_s10  ;;  %p331_p2 = scmp.lt.s32.totalorder %s325_s10, %s325_s10 }
  0x18   :  { %318 = vmatprep.subr.bf16.mxu1 %v317_v54 }
  0x19   :  { %308 = vmatpush3.bf16.msra.mxu0 %v307_v38  ;;  %320 = vmatpush1.bf16.msra.mxu1 %v319_v57  ;;  %p332_p3 = por %p331_p2, %p330_p1 }
  0x1a   :  { %310 = vmatprep.subr.bf16.mxu0 %v309_v39 }
  0x1b   :  { %p333_p4 = pnand %p332_p3, %p326_p0 }
  0x1d   :  { %312 = vmatpush3.bf16.msra.mxu0 %v311_v44 }
  0x1e   :  { %314 = vmatprep.subr.bf16.mxu0 %v313_v45 }
  0x21   :  { %316 = vmatpush3.bf16.msra.mxu0 %v315_v48 }
  0x24   :  { %120 = vmatmul.mubr.f32.vlgmr.msra.gmra.mrb[0].mxu0 %v19_v49 }
  0x25   :  { %124 = vmatprep.mubr.f32.mxu0 %v22_v50 }
  0x28   :  { %125 = vmatmul.mubr.f32.gmra.mrb[2].mxu0 %v21_v51 }
  0xf7   :  { %v279_v59 = vpop.f32.mrb[0].mxu0 }
  0xf8   :  { %v280_v60 = vpop.f32.mrb[1].mxu0 }
  0xf9   :  { %v281_v61 = vadd.f32 %v280_v60, %v279_v59 }
  0xfb   :  { %v130_v62 = vmul.f32 0.0625, %v281_v61  ;;  %v282_v63 = vpop.f32.mrb[2].mxu0 }
  0xfc   :  { %v283_v0 = vpop.f32.mrb[3].mxu0 }
  0xfd   :  { %133 = vst.msk [vmem:[#allocation2] sm:$0xff] %vm132_vm0, %v130_v62  ;;  %v284_v1 = vadd.f32 %v283_v0, %v282_v63 }
  0xff   :  { %v131_v2 = vmul.f32 0.0625, %v284_v1 }
 0x101   :  { %134 = vst.msk [vmem:[#allocation2 + $0x8] sm:$0xff] %vm132_vm0, %v131_v2 }
 0x104   :  { %v135_v3 = vld [vmem:[#allocation2] sm:$0xff] }
 0x105   :  { %245 = vmatmul.mubr.msk.f32.vlgmr.msra.gmra.mrb[0].mxu1 %vm132_vm0, %v135_v3 }
 0x106   :  { %218 = vmatprep.mubr.f32.mxu1 %v349_v58 }
 0x108   :  { %v136_v4 = vld [vmem:[#allocation2 + $0x8] sm:$0xff] }
 0x109   :  { %246 = vmatmul.mubr.msk.f32.gmra.mrb[2].mxu1 %vm132_vm0, %v136_v4 }
 0x1d8   :  { %v214_v5 = vpop.f32.mrb[0].mxu1 }
 0x1d9   :  { %225 = vst [vmem:[#allocation3] sm:$0xff] %v214_v5  ;;  %v216_v6 = vpop.f32.mrb[1].mxu1 }
 0x1da   :  { %226 = vst [vmem:[#allocation3 + $0x8] sm:$0xff] %v216_v6 }
 0x1dc   :  { %v220_v7 = vpop.f32.mrb[2].mxu1 }
 0x1dd   :  { %227 = vst [vmem:[#allocation3 + $0x10] sm:$0xff] %v220_v7  ;;  %v222_v8 = vpop.f32.mrb[3].mxu1 }
 0x1de   :  { %228 = vst [vmem:[#allocation3 + $0x18] sm:$0xff] %v222_v8 }
 0x1df   :  { %336 = shalt.err (!%p333_p4)
}
 0x1e0   :  { %s337_s13 = scalar_lea.hbm %s508_s3, 512 }
 0x1e1   :  { %p338_p5 = scmp.ne.s32.totalorder %s508_s3, %s337_s13  ;;  %p341_p6 = scmp.lt.u32.totalorder %s337_s13, %s508_s3 }
 0x1e3   :  { %p343_p7 = pnand %p341_p6, %p338_p5 }
 0x1e5   :  { %346 = shalt.err (!%p343_p7)
}
 0x1e6   :  { %s351_s18 = smov 256   ;;  %s352_s19 = smov 16  }
 0x1e7   :  { %240 = dma.vmem_to_hbm [thread:$0]  %s235_s2, 512, %s508_s3, [#allocation4], %s351_s18, %s351_s18, %s352_s19  }
 0x1e8   :  { %347 = dma.done.wait [#allocation4], 512  }
 0x1e9   :  { %348 = vsyncadd [#allocation4], 4294966784 }
 0x1ea   :  { %244 = vsyncpa [#allocation4], 1 }

</bundles_post_ra>
